<compile_context>
chip_gen: v7x
topology: tpu7x:2x2x1
jax: 0.10.0
libtpu: 0.0.40
codegen_flags: <defaults>
</compile_context>

<pallas_src>
import jax
import jax.numpy as jnp
from jax.experimental import pallas as pl
from jax.experimental.pallas import tpu as pltpu


# ----------------------------- Pallas kernel --------------------------------

def nc1_kernel(adj_ref, x_ref, w1_ref, b1_ref, w2_ref, b2_ref, out_ref):
    adj = adj_ref[...]

    # GCN layer 1:  relu(A_norm @ (X @ W1) + b1)   (XW-before-A reordering)
    xw1 = jnp.dot(x_ref[...], w1_ref[...], preferred_element_type=jnp.float32)
    h = jnp.dot(adj, xw1, preferred_element_type=jnp.float32) + b1_ref[...]
    h = jnp.maximum(h, 0.0)

    # F.dropout(h, training=self.training): identity in eval mode.
    # TODO(synk): training-mode dropout would use pltpu.prng_seed +
    #             pltpu.stateful_bernoulli; inference path implemented here.

    # GCN layer 2:  A_norm @ (h @ W2) + b2
    hw2 = jnp.dot(h, w2_ref[...], preferred_element_type=jnp.float32)
    y = jnp.dot(adj, hw2, preferred_element_type=jnp.float32) + b2_ref[...]

    # log_softmax over classes (axis=1)
    m = jnp.max(y, axis=1, keepdims=True)
    z = y - m
    lse = jnp.log(jnp.sum(jnp.exp(z), axis=1, keepdims=True))
    out_ref[...] = z - lse


_VMEM = pl.BlockSpec(memory_space=pltpu.MemorySpace.VMEM)


def nc1_pallas(adj, x, w1, b1, w2, b2):
    n = x.shape[0]
    classes = w2.shape[1]
    return pl.pallas_call(
        nc1_kernel,
        out_shape=jax.ShapeDtypeStruct((n, classes), jnp.float32),
        in_specs=[_VMEM] * 6,
        out_specs=_VMEM,
    )(adj, x, w1, b1, w2, b2)


# --------------------- GCN normalization (outside kernel) -------------------

def normalized_adjacency(edge_index, num_nodes):
    """Dense D^{-1/2}(A+I)D^{-1/2}; A[dst, src] = 1 (messages flow src->dst)."""
    src = edge_index[0]
    dst = edge_index[1]
    loop = jnp.arange(num_nodes, dtype=src.dtype)
    src = jnp.concatenate([src, loop])
    dst = jnp.concatenate([dst, loop])
    w = jnp.ones((src.shape[0],), jnp.float32)
    adj = jnp.zeros((num_nodes, num_nodes), jnp.float32).at[dst, src].add(w)
    deg = adj.sum(axis=1)
    dinv = jnp.where(deg > 0, 1.0 / jnp.sqrt(deg), 0.0)
    return dinv[:, None] * adj * dinv[None, :]


@jax.jit
def nc1_forward(x, edge_index, params):
    adj = normalized_adjacency(edge_index, x.shape[0])
    (w1, b1), (w2, b2) = params["conv1"], params["conv2"]
    return nc1_pallas(adj, x, w1, b1, w2, b2)


# --------------------------------- setup ------------------------------------

def glorot(key, fan_in, fan_out):
    bound = jnp.sqrt(6.0 / (fan_in + fan_out))
    return jax.random.uniform(key, (fan_in, fan_out), jnp.float32,
                              -bound, bound)


def make_params(key, features, hidden, classes):
    k1, k2 = jax.random.split(key)
    return {
        "conv1": (glorot(k1, features, hidden), jnp.zeros((1, hidden), jnp.float32)),
        "conv2": (glorot(k2, hidden, classes), jnp.zeros((1, classes), jnp.float32)),
    }


if __name__ == "__main__":
    NUM_NODES, FEATURES, HIDDEN, CLASSES, NUM_EDGES = 64, 32, 16, 8, 256

    key = jax.random.PRNGKey(0)
    k_param, k_x, k_e = jax.random.split(key, 3)

    params = make_params(k_param, FEATURES, HIDDEN, CLASSES)
    x = jax.random.normal(k_x, (NUM_NODES, FEATURES), jnp.float32)
    edge_index = jax.random.randint(k_e, (2, NUM_EDGES), 0, NUM_NODES,
                                    dtype=jnp.int32)

    out = nc1_forward(x, edge_index, params)
    out = jax.block_until_ready(out)

    assert out.shape == (NUM_NODES, CLASSES)
    assert bool(jnp.all(jnp.isfinite(out)))
    # log_softmax property: exp(out) rows sum to 1
    row_sums = jnp.sum(jnp.exp(out), axis=1)
    assert bool(jnp.all(jnp.abs(row_sums - 1.0) < 1e-3))
    print("KERNEL_OK")
</pallas_src>

<mosaic_0001>
module attributes {stable_mosaic.version = 11 : i64} {
  func.func private @main(%arg0: i32) attributes {dimension_semantics = [#tpu.dimension_semantics<core_parallel>], iteration_bounds = array<i64: 2>, tpu.core_type = #tpu.core_type<sc_scalar_subcore>, window_params = []} {
    return
  }
}

module attributes {stable_mosaic.version = 11 : i64} {
  func.func private @main(%arg0: i32) attributes {dimension_semantics = [#tpu.dimension_semantics<core_parallel>], iteration_bounds = array<i64: 2>, tpu.core_type = #tpu.core_type<sc_scalar_subcore>, window_params = []} {
    return
  }
}

module attributes {stable_mosaic.version = 11 : i64} {
  func.func @nc1_kernel(%arg0: memref<64x64xf32, #tpu.memory_space<vmem>>, %arg1: memref<64x32xf32, #tpu.memory_space<vmem>>, %arg2: memref<32x16xf32, #tpu.memory_space<vmem>>, %arg3: memref<1x16xf32, #tpu.memory_space<vmem>>, %arg4: memref<16x8xf32, #tpu.memory_space<vmem>>, %arg5: memref<1x8xf32, #tpu.memory_space<vmem>>, %arg6: memref<64x8xf32, #tpu.memory_space<vmem>>) attributes {dimension_semantics = [], scalar_prefetch = 0 : i64, scratch_operands = 0 : i64, tpu.core_type = #tpu.core_type<tc>} {
    %c0 = arith.constant 0 : index
    %c0_0 = arith.constant 0 : index
    %0 = vector.load %arg0[%c0, %c0_0] : memref<64x64xf32, #tpu.memory_space<vmem>>, vector<64x64xf32>
    %c0_1 = arith.constant 0 : index
    %c0_2 = arith.constant 0 : index
    %1 = vector.load %arg1[%c0_1, %c0_2] : memref<64x32xf32, #tpu.memory_space<vmem>>, vector<64x32xf32>
    %c0_3 = arith.constant 0 : index
    %c0_4 = arith.constant 0 : index
    %2 = vector.load %arg2[%c0_3, %c0_4] : memref<32x16xf32, #tpu.memory_space<vmem>>, vector<32x16xf32>
    %cst = arith.constant dense<0.000000e+00> : vector<64x16xf32>
    %3 = tpu.matmul %1, %2, %cst {dimension_numbers = #tpu.dot_dimension_numbers<[1], [0], [0], [1], [0, 0, 1, 1], [], []>} : vector<64x32xf32>, vector<32x16xf32>, vector<64x16xf32> -> vector<64x16xf32>
    %cst_5 = arith.constant dense<0.000000e+00> : vector<64x16xf32>
    %4 = tpu.matmul %0, %3, %cst_5 {dimension_numbers = #tpu.dot_dimension_numbers<[1], [0], [0], [1], [0, 0, 1, 1], [], []>} : vector<64x64xf32>, vector<64x16xf32>, vector<64x16xf32> -> vector<64x16xf32>
    %c0_6 = arith.constant 0 : index
    %c0_7 = arith.constant 0 : index
    %5 = vector.load %arg3[%c0_6, %c0_7] : memref<1x16xf32, #tpu.memory_space<vmem>>, vector<1x16xf32>
    %6 = vector.broadcast %5 : vector<1x16xf32> to vector<64x16xf32>
    %7 = arith.addf %4, %6 : vector<64x16xf32>
    %cst_8 = arith.constant 0.000000e+00 : f32
    %8 = vector.broadcast %cst_8 : f32 to vector<64x16xf32>
    %9 = arith.maximumf %7, %8 : vector<64x16xf32>
    %c0_9 = arith.constant 0 : index
    %c0_10 = arith.constant 0 : index
    %10 = vector.load %arg4[%c0_9, %c0_10] : memref<16x8xf32, #tpu.memory_space<vmem>>, vector<16x8xf32>
    %cst_11 = arith.constant dense<0.000000e+00> : vector<64x8xf32>
    %11 = tpu.matmul %9, %10, %cst_11 {dimension_numbers = #tpu.dot_dimension_numbers<[1], [0], [0], [1], [0, 0, 1, 1], [], []>} : vector<64x16xf32>, vector<16x8xf32>, vector<64x8xf32> -> vector<64x8xf32>
    %cst_12 = arith.constant dense<0.000000e+00> : vector<64x8xf32>
    %12 = tpu.matmul %0, %11, %cst_12 {dimension_numbers = #tpu.dot_dimension_numbers<[1], [0], [0], [1], [0, 0, 1, 1], [], []>} : vector<64x64xf32>, vector<64x8xf32>, vector<64x8xf32> -> vector<64x8xf32>
    %c0_13 = arith.constant 0 : index
    %c0_14 = arith.constant 0 : index
    %13 = vector.load %arg5[%c0_13, %c0_14] : memref<1x8xf32, #tpu.memory_space<vmem>>, vector<1x8xf32>
    %14 = vector.broadcast %13 : vector<1x8xf32> to vector<64x8xf32>
    %15 = arith.addf %12, %14 : vector<64x8xf32>
    %cst_15 = arith.constant dense<0xFF800000> : vector<64xf32>
    %16 = vector.multi_reduction <maximumf>, %15, %cst_15 [1] : vector<64x8xf32> to vector<64xf32>
    %17 = vector.shape_cast %16 : vector<64xf32> to vector<64x1xf32>
    %18 = vector.broadcast %17 : vector<64x1xf32> to vector<64x8xf32>
    %19 = arith.subf %15, %18 : vector<64x8xf32>
    %20 = math.exp %19 : vector<64x8xf32>
    %cst_16 = arith.constant dense<0.000000e+00> : vector<64xf32>
    %21 = vector.multi_reduction <add>, %20, %cst_16 [1] : vector<64x8xf32> to vector<64xf32>
    %22 = vector.shape_cast %21 : vector<64xf32> to vector<64x1xf32>
    %23 = math.log %22 : vector<64x1xf32>
    %24 = vector.broadcast %23 : vector<64x1xf32> to vector<64x8xf32>
    %25 = arith.subf %19, %24 : vector<64x8xf32>
    %c0_17 = arith.constant 0 : index
    %c0_18 = arith.constant 0 : index
    %26 = vector.load %arg6[%c0_17, %c0_18] : memref<64x8xf32, #tpu.memory_space<vmem>>, vector<64x8xf32>
    tpu.vector_store %arg6[%c0_17, %c0_18], %25 {strides = array<i32>} : memref<64x8xf32, #tpu.memory_space<vmem>>, vector<64x8xf32>,
    return
  }
}

</mosaic_0001>

<bundles_post_ra>
// kernel: nc1_forward.1
= control target key start
LH: loop header
LB: loop body
LE: loop exit
PB: predicated region body
PF: predicated region fallthrough
CT: control target
= control target key end

     0   :  { %vm43_vm0 = vcmask 261120   ;;  %vm180_vm1 = vcmask 523264   ;;  %vm320_vm2 = vcmask 130048   ;;  %vm562_vm3 = vcmask 64512   ;;  %s1182_s2 = inlined_call_operand.vmem [shape: f32[32,16], index: 2, kind: input, shape index: {}]   ;;  %s1183_s1 = inlined_call_operand.vmem [shape: f32[64,32], index: 1, kind: input, shape index: {}]   ;;  %s1184_s0 = inlined_call_operand.vmem [shape: f32[64,64], index: 0, kind: input, shape index: {}]   ;;  %s1185_s4 = inlined_call_operand.vmem [shape: f32[16,8], index: 4, kind: input, shape index: {}]   ;;  %s1186_s3 = inlined_call_operand.vmem [shape: f32[1,16], index: 3, kind: input, shape index: {}]   ;;  %s1187_s5 = inlined_call_operand.vmem [shape: f32[1,8], index: 5, kind: input, shape index: {}]   ;;  %s1188_s6 = inlined_call_operand.vmem [shape: f32[64,8], index: 6, kind: output, shape index: {}]  }
   0x1   :  { %v39_v0 = vld [vmem:[%s1182_s2] sm:$0xff]  ;;  %v40_v1 = vld [vmem:[%s1182_s2 + $0x8] sm:$0xff]  ;;  %v41_v2 = vld [vmem:[%s1182_s2 + $0x10] sm:$0xff] }
   0x2   :  { %v851_v3 = vpack.c.bf16 %v40_v1, %v39_v0  ;;  %v42_v4 = vld [vmem:[%s1182_s2 + $0x18] sm:$0xff]  ;;  %v31_v5 = vld [vmem:[%s1183_s1] sm:$0xff]  ;;  %v32_v7 = vld [vmem:[%s1183_s1 + $0x8] sm:$0xff] }
   0x3   :  { %v855_v6 = vpack.c.bf16 %v42_v4, %v41_v2  ;;  %767 = vmatprep.mubr.msk.f32.mxu0 %vm43_vm0, %v31_v5  ;;  %v33_v8 = vld [vmem:[%s1183_s1 + $0x10] sm:$0xff]  ;;  %v34_v9 = vld [vmem:[%s1183_s1 + $0x18] sm:$0xff]  ;;  %v35_v10 = vld [vmem:[%s1183_s1 + $0x20] sm:$0xff] }
   0x4   :  { %852 = vmatprep.subr.bf16.mxu0 %v851_v3  ;;  %v36_v11 = vld [vmem:[%s1183_s1 + $0x28] sm:$0xff]  ;;  %v37_v12 = vld [vmem:[%s1183_s1 + $0x30] sm:$0xff]  ;;  %v38_v13 = vld [vmem:[%s1183_s1 + $0x38] sm:$0xff] }
   0x5   :  { %854 = vmatpush3.bf16.msra.mxu0 %v851_v3  ;;  %v1017_v14 = vld [vmem:[%s1184_s0] sm:$0xff]  ;;  %v319_v16 = vld [vmem:[%s1185_s4 + $0x8] sm:$0xff]  ;;  %v25_v31 = vld [vmem:[%s1184_s0 + $0x10] sm:$0xff] }
   0x6   :  { %856 = vmatprep.subr.bf16.mxu0 %v855_v6  ;;  %795 = vmatprep.mubr.msk.f32.mxu1 %vm180_vm1, %v1017_v14  ;;  %v318_v15 = vld [vmem:[%s1185_s4] sm:$0xff]  ;;  %v1030_v30 = vld [vmem:[%s1184_s0 + $0x8] sm:$0xff]  ;;  %v1041_v32 = vld [vmem:[%s1184_s0 + $0x18] sm:$0xff] }
   0x7   :  { %v875_v17 = vpack.c.bf16 %v319_v16, %v318_v15  ;;  %v1046_v33 = vld [vmem:[%s1184_s0 + $0x20] sm:$0xff]  ;;  %v1055_v34 = vld [vmem:[%s1184_s0 + $0x28] sm:$0xff]  ;;  %v1060_v35 = vld [vmem:[%s1184_s0 + $0x30] sm:$0xff] }
   0x8   :  { %v1069_v36 = vld [vmem:[%s1184_s0 + $0x38] sm:$0xff]  ;;  %v679_v37 = vld [vmem:[%s1186_s3] ss:$0 sm:$0xff] }
   0x9   :  { %858 = vmatpush3.bf16.msra.mxu0 %v855_v6 }
   0xa   :  { %876 = vmatprep.subr.bf16.mxu0 %v875_v17 }
   0xc   :  { %768 = vmatmul.mubr.msk.f32.vlgmr.msra.gmra.mrb[0].mxu0 %vm43_vm0, %v32_v7 }
   0xd   :  { %770 = vmatprep.mubr.msk.f32.mxu0 %vm43_vm0, %v33_v8  ;;  %878 = vmatpush3.bf16.msra.mxu0 %v875_v17 }
  0x10   :  { %771 = vmatmul.mubr.msk.f32.gmra.mrb[2].mxu0 %vm43_vm0, %v34_v9 }
  0x11   :  { %773 = vmatprep.mubr.msk.f32.mxu0 %vm43_vm0, %v35_v10  ;;  %v696_v10 = vld [vmem:[%s1187_s5] ss:$0 sm:$0xff] }
  0x14   :  { %774 = vmatmul.mubr.msk.f32.gmra.mrb[4].mxu0 %vm43_vm0, %v36_v11 }
  0x15   :  { %776 = vmatprep.mubr.msk.f32.mxu0 %vm43_vm0, %v37_v12 }
  0x18   :  { %777 = vmatmul.mubr.msk.f32.gmra.mrb[6].mxu0 %vm43_vm0, %v38_v13 }
  0xdf   :  { %v769_v18 = vpop.f32.mrb[0].mxu0 }
  0xe0   :  { %v134_v19 = vpop.f32.mrb[1].mxu0 }
  0xe1   :  { %v859_v20 = vpack.c.bf16 %v769_v18, %v134_v19 }
  0xe3   :  { %v772_v21 = vpop.f32.mrb[2].mxu0  ;;  %860 = vmatprep.subr.bf16.mxu1 %v859_v20 }
  0xe4   :  { %v144_v22 = vpop.f32.mrb[3].mxu0  ;;  %862 = vmatpush3.bf16.msra.mxu1 %v859_v20 }
  0xe5   :  { %v863_v23 = vpack.c.bf16 %v772_v21, %v144_v22 }
  0xe7   :  { %v775_v24 = vpop.f32.mrb[4].mxu0  ;;  %864 = vmatprep.subr.bf16.mxu1 %v863_v23 }
  0xe8   :  { %v154_v25 = vpop.f32.mrb[5].mxu0  ;;  %866 = vmatpush3.bf16.msra.mxu1 %v863_v23 }
  0xe9   :  { %v867_v26 = vpack.c.bf16 %v775_v24, %v154_v25 }
  0xeb   :  { %v778_v27 = vpop.f32.mrb[6].mxu0  ;;  %868 = vmatprep.subr.bf16.mxu1 %v867_v26 }
  0xec   :  { %v164_v28 = vpop.f32.mrb[7].mxu0  ;;  %870 = vmatpush3.bf16.msra.mxu1 %v867_v26 }
  0xed   :  { %v871_v29 = vpack.c.bf16 %v778_v27, %v164_v28 }
  0xef   :  { %872 = vmatprep.subr.bf16.mxu1 %v871_v29 }
  0xf0   :  { %874 = vmatpush3.bf16.msra.mxu1 %v871_v29 }
  0xf3   :  { %796 = vmatmul.mubr.msk.f32.vlgmr.msra.gmra.mrb[0].mxu1 %vm180_vm1, %v1030_v30 }
  0xf4   :  { %798 = vmatprep.mubr.msk.f32.mxu1 %vm180_vm1, %v25_v31 }
  0xf7   :  { %799 = vmatmul.mubr.msk.f32.gmra.mrb[2].mxu1 %vm180_vm1, %v1041_v32 }
  0xf8   :  { %801 = vmatprep.mubr.msk.f32.mxu1 %vm180_vm1, %v1046_v33 }
  0xfb   :  { %802 = vmatmul.mubr.msk.f32.gmra.mrb[4].mxu1 %vm180_vm1, %v1055_v34 }
  0xfc   :  { %804 = vmatprep.mubr.msk.f32.mxu1 %vm180_vm1, %v1060_v35 }
  0xff   :  { %805 = vmatmul.mubr.msk.f32.gmra.mrb[6].mxu1 %vm180_vm1, %v1069_v36 }
 0x100   :  { %842 = vmatprep.mubr.msk.f32.mxu1 %vm180_vm1, %v25_v31 }
 0x1c6   :  { %v797_v38 = vpop.f32.mrb[0].mxu1 }
 0x1c7   :  { %v277_v39 = vadd.f32 %v797_v38, %v679_v37  ;;  %v271_v40 = vpop.f32.mrb[1].mxu1 }
 0x1c8   :  { %v272_v41 = vadd.f32 %v679_v37, %v271_v40 }
 0x1c9   :  { %v311_v44 = vmax.f32 %v277_v39, 0.0 }
 0x1ca   :  { %v310_v42 = vmax.f32 %v272_v41, 0.0  ;;  %v800_v43 = vpop.f32.mrb[2].mxu1 }
 0x1cb   :  { %v287_v45 = vadd.f32 %v800_v43, %v679_v37  ;;  %v281_v46 = vpop.f32.mrb[3].mxu1 }
 0x1cc   :  { %v282_v47 = vadd.f32 %v679_v37, %v281_v46  ;;  %811 = vmatprep.mubr.msk.f32.mxu0 %vm320_vm2, %v310_v42 }
 0x1cd   :  { %812 = vmatmul.mubr.msk.f32.vlgmr.msra.gmra.mrb[8].mxu0 %vm320_vm2, %v311_v44  ;;  %v313_v50 = vmax.f32 %v287_v45, 0.0 }
 0x1ce   :  { %v312_v48 = vmax.f32 %v282_v47, 0.0  ;;  %v803_v49 = vpop.f32.mrb[4].mxu1 }
 0x1cf   :  { %v297_v51 = vadd.f32 %v803_v49, %v679_v37  ;;  %v291_v52 = vpop.f32.mrb[5].mxu1 }
 0x1d0   :  { %v292_v53 = vadd.f32 %v679_v37, %v291_v52  ;;  %814 = vmatprep.mubr.msk.f32.mxu0 %vm320_vm2, %v312_v48 }
 0x1d1   :  { %815 = vmatmul.mubr.msk.f32.gmra.mrb[10].mxu0 %vm320_vm2, %v313_v50  ;;  %v315_v56 = vmax.f32 %v297_v51, 0.0 }
 0x1d2   :  { %v314_v54 = vmax.f32 %v292_v53, 0.0  ;;  %v806_v55 = vpop.f32.mrb[6].mxu1 }
 0x1d3   :  { %v307_v57 = vadd.f32 %v806_v55, %v679_v37  ;;  %v301_v58 = vpop.f32.mrb[7].mxu1 }
 0x1d4   :  { %v302_v59 = vadd.f32 %v679_v37, %v301_v58  ;;  %817 = vmatprep.mubr.msk.f32.mxu0 %vm320_vm2, %v314_v54 }
 0x1d5   :  { %818 = vmatmul.mubr.msk.f32.gmra.mrb[12].mxu0 %vm320_vm2, %v315_v56  ;;  %v317_v61 = vmax.f32 %v307_v57, 0.0 }
 0x1d6   :  { %v316_v60 = vmax.f32 %v302_v59, 0.0 }
 0x1d8   :  { %820 = vmatprep.mubr.msk.f32.mxu0 %vm320_vm2, %v316_v60 }
 0x1d9   :  { %821 = vmatmul.mubr.msk.f32.gmra.mrb[14].mxu0 %vm320_vm2, %v317_v61 }
 0x1da   :  { %839 = vmatprep.mubr.msk.f32.mxu0 %vm180_vm1, %v1017_v14 }
 0x2a0   :  { %v813_v62 = vpop.f32.mrb[8].mxu0 }
 0x2a1   :  { %v411_v63 = vpop.f32.mrb[9].mxu0 }
 0x2a2   :  { %v879_v0 = vpack.c.bf16 %v813_v62, %v411_v63 }
 0x2a4   :  { %v816_v1 = vpop.f32.mrb[10].mxu0  ;;  %880 = vmatprep.subr.bf16.mxu0 %v879_v0  ;;  %895 = vmatprep.subr.bf16.mxu1 %v879_v0 }
 0x2a5   :  { %v421_v2 = vpop.f32.mrb[11].mxu0  ;;  %882 = vmatpush3.bf16.msra.mxu0 %v879_v0  ;;  %899 = vmatpush3.bf16.msra.mxu1 %v879_v0 }
 0x2a6   :  { %v883_v3 = vpack.c.bf16 %v816_v1, %v421_v2 }
 0x2a8   :  { %v819_v4 = vpop.f32.mrb[12].mxu0  ;;  %884 = vmatprep.subr.bf16.mxu0 %v883_v3  ;;  %896 = vmatprep.subr.bf16.mxu1 %v883_v3 }
 0x2a9   :  { %v431_v5 = vpop.f32.mrb[13].mxu0  ;;  %886 = vmatpush3.bf16.msra.mxu0 %v883_v3  ;;  %900 = vmatpush3.bf16.msra.mxu1 %v883_v3 }
 0x2aa   :  { %v887_v6 = vpack.c.bf16 %v819_v4, %v431_v5 }
 0x2ac   :  { %v822_v7 = vpop.f32.mrb[14].mxu0  ;;  %888 = vmatprep.subr.bf16.mxu0 %v887_v6  ;;  %897 = vmatprep.subr.bf16.mxu1 %v887_v6 }
 0x2ad   :  { %v441_v8 = vpop.f32.mrb[15].mxu0  ;;  %890 = vmatpush3.bf16.msra.mxu0 %v887_v6  ;;  %901 = vmatpush3.bf16.msra.mxu1 %v887_v6 }
 0x2ae   :  { %v891_v9 = vpack.c.bf16 %v822_v7, %v441_v8 }
 0x2b0   :  { %892 = vmatprep.subr.bf16.mxu0 %v891_v9  ;;  %898 = vmatprep.subr.bf16.mxu1 %v891_v9 }
 0x2b1   :  { %894 = vmatpush3.bf16.msra.mxu0 %v891_v9  ;;  %902 = vmatpush3.bf16.msra.mxu1 %v891_v9 }
 0x2b4   :  { %840 = vmatmul.mubr.msk.f32.vlgmr.msra.gmra.mrb[16].mxu0 %vm180_vm1, %v1030_v30  ;;  %843 = vmatmul.mubr.msk.f32.vlgmr.msra.gmra.mrb[8].mxu1 %vm180_vm1, %v1041_v32 }
 0x2b5   :  { %845 = vmatprep.mubr.msk.f32.mxu1 %vm180_vm1, %v1046_v33 }
 0x2b8   :  { %846 = vmatmul.mubr.msk.f32.gmra.mrb[10].mxu1 %vm180_vm1, %v1055_v34 }
 0x2b9   :  { %848 = vmatprep.mubr.msk.f32.mxu1 %vm180_vm1, %v1060_v35 }
 0x2bc   :  { %849 = vmatmul.mubr.msk.f32.gmra.mrb[12].mxu1 %vm180_vm1, %v1069_v36 }
 0x387   :  { %v841_v11 = vpop.f32.mrb[16].mxu0  ;;  %v844_v12 = vpop.f32.mrb[8].mxu1 }
 0x388   :  { %v529_v13 = vadd.f32 %v841_v11, %v696_v10  ;;  %v539_v14 = vadd.f32 %v844_v12, %v696_v10  ;;  %v523_v15 = vpop.f32.mrb[17].mxu0  ;;  %v533_v16 = vpop.f32.mrb[9].mxu1 }
 0x389   :  { %v534_v17 = vadd.f32 %v696_v10, %v533_v16  ;;  %v524_v18 = vadd.f32 %v696_v10, %v523_v15 }
 0x38a   :  { %v572_v19 = vsel %vm562_vm3, %v539_v14, -inf  ;;  %v566_v20 = vsel %vm562_vm3, %v529_v13, -inf }
 0x38b   :  { %573 = vmax.xlane.f32.xlu1 %v572_v19  ;;  %567 = vmax.xlane.f32.xlu0 %v566_v20  ;;  %v847_v21 = vpop.f32.mrb[10].mxu1  ;;  %v569_v24 = vsel %vm562_vm3, %v534_v17, -inf  ;;  %v563_v26 = vsel %vm562_vm3, %v524_v18, -inf }
 0x38c   :  { %v549_v22 = vadd.f32 %v847_v21, %v696_v10  ;;  %v543_v23 = vpop.f32.mrb[11].mxu1 }
 0x38d   :  { %v544_v25 = vadd.f32 %v696_v10, %v543_v23 }
 0x38e   :  { %v578_v30 = vsel %vm562_vm3, %v549_v22, -inf }
 0x38f   :  { %570 = vmax.xlane.f32.xlu1 %v569_v24  ;;  %564 = vmax.xlane.f32.xlu0 %v563_v26  ;;  %v850_v27 = vpop.f32.mrb[12].mxu1  ;;  %v575_v31 = vsel %vm562_vm3, %v544_v25, -inf }
 0x390   :  { %v559_v28 = vadd.f32 %v850_v27, %v696_v10  ;;  %v553_v29 = vpop.f32.mrb[13].mxu1 }
 0x391   :  { %v554_v32 = vadd.f32 %v696_v10, %v553_v29 }
 0x392   :  { %v584_v33 = vsel %vm562_vm3, %v559_v28, -inf }
 0x393   :  { %579 = vmax.xlane.f32.xlu1 %v578_v30  ;;  %576 = vmax.xlane.f32.xlu0 %v575_v31  ;;  %v581_v34 = vsel %vm562_vm3, %v554_v32, -inf }
 0x397   :  { %585 = vmax.xlane.f32.xlu1 %v584_v33  ;;  %582 = vmax.xlane.f32.xlu0 %v581_v34 }
 0x418   :  { %v574_v35 = vpop.xlane.xlu1 %573  ;;  %v568_v36 = vpop.xlane.xlu0 %567 }
 0x419   :  { %v1110_v37 = vsub.f32 %v539_v14, %v574_v35  ;;  %v1112_v38 = vsub.f32 %v529_v13, %v568_v36 }
 0x41b   :  { %v597_v39 = vmul.f32 1.442695, %v1112_v38  ;;  %v601_v40 = vmul.f32 1.442695, %v1110_v37 }
 0x41c   :  { %v571_v41 = vpop.xlane.xlu1 %570  ;;  %v565_v42 = vpop.xlane.xlu0 %564 }
 0x41d   :  { %v1116_v43 = vsub.f32 %v534_v17, %v571_v41  ;;  %v1118_v44 = vsub.f32 %v524_v18, %v565_v42  ;;  %903 = vpow2.f32 %v597_v39 }
 0x41e   :  { %905 = vpow2.f32 %v601_v40 }
 0x41f   :  { %v595_v45 = vmul.f32 1.442695, %v1118_v44  ;;  %v599_v46 = vmul.f32 1.442695, %v1116_v43 }
 0x420   :  { %v580_v47 = vpop.xlane.xlu1 %579  ;;  %v577_v48 = vpop.xlane.xlu0 %576 }
 0x421   :  { %v1122_v49 = vsub.f32 %v549_v22, %v580_v47  ;;  %v1124_v50 = vsub.f32 %v544_v25, %v577_v48  ;;  %907 = vpow2.f32 %v595_v45 }
 0x422   :  { %909 = vpow2.f32 %v599_v46 }
 0x423   :  { %v605_v51 = vmul.f32 1.442695, %v1122_v49  ;;  %v603_v52 = vmul.f32 1.442695, %v1124_v50 }
 0x424   :  { %v586_v53 = vpop.xlane.xlu1 %585  ;;  %v583_v54 = vpop.xlane.xlu0 %582 }
 0x425   :  { %911 = vpow2.f32 %v605_v51  ;;  %v1128_v55 = vsub.f32 %v559_v28, %v586_v53  ;;  %v1130_v56 = vsub.f32 %v554_v32, %v583_v54 }
 0x426   :  { %913 = vpow2.f32 %v603_v52 }
 0x427   :  { %v609_v57 = vmul.f32 1.442695, %v1128_v55  ;;  %v904_v58 = vpop.eup %903  ;;  %v607_v59 = vmul.f32 1.442695, %v1130_v56 }
 0x428   :  { %v614_v60 = vsel %vm562_vm3, %v904_v58, 0.0  ;;  %v906_v61 = vpop.eup %905 }
 0x429   :  { %915 = vpow2.f32 %v609_v57  ;;  %615 = vadd.xlane.f32.xlu1 %v614_v60  ;;  %v620_v63 = vsel %vm562_vm3, %v906_v61, 0.0 }
 0x42a   :  { %917 = vpow2.f32 %v607_v59 }
 0x42b   :  { %v908_v62 = vpop.eup %907 }
 0x42c   :  { %v611_v0 = vsel %vm562_vm3, %v908_v62, 0.0  ;;  %v910_v1 = vpop.eup %909 }
 0x42d   :  { %621 = vadd.xlane.f32.xlu1 %v620_v63  ;;  %612 = vadd.xlane.f32.xlu0 %v611_v0  ;;  %v617_v4 = vsel %vm562_vm3, %v910_v1, 0.0 }
 0x42f   :  { %v912_v2 = vpop.eup %911 }
 0x430   :  { %v626_v3 = vsel %vm562_vm3, %v912_v2, 0.0  ;;  %v914_v5 = vpop.eup %913 }
 0x431   :  { %627 = vadd.xlane.f32.xlu1 %v626_v3  ;;  %618 = vadd.xlane.f32.xlu0 %v617_v4  ;;  %v623_v8 = vsel %vm562_vm3, %v914_v5, 0.0 }
 0x433   :  { %v916_v6 = vpop.eup %915 }
 0x434   :  { %v632_v7 = vsel %vm562_vm3, %v916_v6, 0.0  ;;  %v918_v9 = vpop.eup %917 }
 0x435   :  { %633 = vadd.xlane.f32.xlu1 %v632_v7  ;;  %624 = vadd.xlane.f32.xlu0 %v623_v8  ;;  %v629_v10 = vsel %vm562_vm3, %v918_v9, 0.0 }
 0x439   :  { %630 = vadd.xlane.f32.xlu0 %v629_v10 }
 0x4b6   :  { %v616_v11 = vpop.xlane.xlu1 %615 }
 0x4b7   :  { %919 = vlog2.f32 %v616_v11 }
 0x4ba   :  { %v622_v12 = vpop.xlane.xlu1 %621  ;;  %v613_v13 = vpop.xlane.xlu0 %612 }
 0x4bb   :  { %921 = vlog2.f32 %v622_v12 }
 0x4bc   :  { %923 = vlog2.f32 %v613_v13 }
 0x4be   :  { %v628_v14 = vpop.xlane.xlu1 %627  ;;  %v619_v15 = vpop.xlane.xlu0 %618 }
 0x4bf   :  { %925 = vlog2.f32 %v628_v14 }
 0x4c0   :  { %927 = vlog2.f32 %v619_v15 }
 0x4c1   :  { %v920_v16 = vpop.eup %919 }
 0x4c2   :  { %v638_v17 = vmul.f32 0.6931472, %v920_v16  ;;  %v634_v18 = vpop.xlane.xlu1 %633  ;;  %v625_v19 = vpop.xlane.xlu0 %624 }
 0x4c3   :  { %929 = vlog2.f32 %v634_v18 }
 0x4c4   :  { %v652_v20 = vsub.f32 %v1112_v38, %v638_v17  ;;  %931 = vlog2.f32 %v625_v19 }
 0x4c5   :  { %v922_v21 = vpop.eup %921 }
 0x4c6   :  { %v924_v22 = vpop.eup %923  ;;  %660 = vst.msk [vmem:[%s1188_s6 + $0x8] sm:$0xff] %vm562_vm3, %v652_v20  ;;  %v642_v23 = vmul.f32 0.6931472, %v922_v21  ;;  %v631_v24 = vpop.xlane.xlu0 %630 }
 0x4c7   :  { %v636_v25 = vmul.f32 0.6931472, %v924_v22  ;;  %933 = vlog2.f32 %v631_v24 }
 0x4c8   :  { %v654_v26 = vsub.f32 %v1110_v37, %v642_v23 }
 0x4c9   :  { %v926_v27 = vpop.eup %925  ;;  %v651_v28 = vsub.f32 %v1118_v44, %v636_v25 }
 0x4ca   :  { %v928_v29 = vpop.eup %927  ;;  %662 = vst.msk [vmem:[%s1188_s6 + $0x18] sm:$0xff] %vm562_vm3, %v654_v26  ;;  %v646_v30 = vmul.f32 0.6931472, %v926_v27 }
 0x4cb   :  { %659 = vst.msk [vmem:[%s1188_s6] sm:$0xff] %vm562_vm3, %v651_v28  ;;  %v640_v31 = vmul.f32 0.6931472, %v928_v29 }
 0x4cc   :  { %v656_v32 = vsub.f32 %v1122_v49, %v646_v30 }
 0x4cd   :  { %v930_v33 = vpop.eup %929  ;;  %v653_v34 = vsub.f32 %v1116_v43, %v640_v31 }
 0x4ce   :  { %v932_v35 = vpop.eup %931  ;;  %664 = vst.msk [vmem:[%s1188_s6 + $0x28] sm:$0xff] %vm562_vm3, %v656_v32  ;;  %v650_v36 = vmul.f32 0.6931472, %v930_v33 }
 0x4cf   :  { %661 = vst.msk [vmem:[%s1188_s6 + $0x10] sm:$0xff] %vm562_vm3, %v653_v34  ;;  %v644_v37 = vmul.f32 0.6931472, %v932_v35 }
 0x4d0   :  { %v658_v38 = vsub.f32 %v1128_v55, %v650_v36 }
 0x4d1   :  { %v934_v39 = vpop.eup %933  ;;  %v655_v40 = vsub.f32 %v1124_v50, %v644_v37 }
 0x4d2   :  { %666 = vst.msk [vmem:[%s1188_s6 + $0x38] sm:$0xff] %vm562_vm3, %v658_v38  ;;  %v648_v41 = vmul.f32 0.6931472, %v934_v39 }
 0x4d3   :  { %663 = vst.msk [vmem:[%s1188_s6 + $0x20] sm:$0xff] %vm562_vm3, %v655_v40 }
 0x4d4   :  { %v657_v42 = vsub.f32 %v1130_v56, %v648_v41 }
 0x4d6   :  { %665 = vst.msk [vmem:[%s1188_s6 + $0x30] sm:$0xff] %vm562_vm3, %v657_v42 }

</bundles_post_ra>
